<compile_context>
chip_gen: v6e
topology: v6e:2x2x1
jax: 0.10.0
libtpu: 0.0.40
codegen_flags: <defaults>
</compile_context>

<pallas_src>
import functools
import math

import jax
import jax.numpy as jnp
from jax.experimental import pallas as pl
from jax.experimental.pallas import tpu as pltpu


def _round_up(x, m):
    return ((x + m - 1) // m) * m


def _chip_defaults():
    """Per-TPU-generation tile targets and scoped-VMEM limit."""
    try:
        kind = jax.devices()[0].device_kind.lower()
    except Exception:
        kind = ""
    if "v7" in kind or "7x" in kind:
        # 64 MiB VMEM/TC: keep working set small; tm>=256 is already past the
        # compute roofline (~310 flops/byte) so no reason to chase bigger row tiles.
        return dict(tm=256, tf=256, align=256, vmem=48 * 2 ** 20)
    if "v6" in kind or "trillium" in kind:
        # Needs ~640+ rows of arithmetic intensity on weight traffic to be MXU-bound.
        return dict(tm=640, tf=512, align=256, vmem=100 * 2 ** 20)
    if "v5 lite" in kind or "v5e" in kind or "v5lite" in kind:
        # Bigger tf halves the number of f32 accumulator read-modify-write passes
        # (relieves v5e's single vector-store slot).
        return dict(tm=512, tf=1024, align=128, vmem=100 * 2 ** 20)
    # Unknown / older generations: conservative tiles, keep the default VMEM limit.
    return dict(tm=256, tf=512, align=128, vmem=None)


def _largest_aligned_divisor(total, target, align):
    """Largest multiple of `align` that divides `total` and is <= target, or None."""
    t = (target // align) * align
    while t >= align:
        if total % t == 0:
            return t
        t -= align
    return None


def ffn_kernel(x_ref, w1_ref, b1_ref, w2_ref, b2_ref, o_ref, acc_ref, *,
               d_ff, block_f, mask_f):
    # x_ref:  (tm, dmodel)  input row tile (original dtype; cast in-kernel)
    # w1_ref: (dmodel, tf)  bf16 W1 tile    b1_ref: (1, tf)     f32 bias slice
    # w2_ref: (tf, dmodel)  bf16 W2 tile    b2_ref: (1, dmodel) f32 bias
    # o_ref:  (tm, dmodel)  output tile     acc_ref: (tm, dmodel) f32 accumulator
    f = pl.program_id(1)

    @pl.when(f == 0)
    def _init():
        acc_ref[...] = jnp.zeros_like(acc_ref)

    # Cast the activation tile to the weight compute dtype inside the kernel so the
    # wrapper never spends an extra HBM pass re-materializing x.
    xb = x_ref[...].astype(w1_ref.dtype)
    h = jnp.dot(xb, w1_ref[...], preferred_element_type=jnp.float32)
    h = jnp.maximum(h + b1_ref[...], 0.0)
    # Dropout: identity (inference mode).
    # TODO(synk): training-mode dropout needs pltpu.prng_seed/prng_random_bits masking.

    w2t = w2_ref[...]
    if mask_f:
        # Last d_ff tile may run past d_ff: zero the overhanging columns/rows so
        # out-of-bounds garbage (possibly NaN) never reaches the accumulator.
        col = jax.lax.broadcasted_iota(jnp.int32, (1, block_f), 1) + f * block_f
        row = jax.lax.broadcasted_iota(jnp.int32, (block_f, 1), 0) + f * block_f
        h = jnp.where(col < d_ff, h, 0.0)
        w2t = jnp.where(row < d_ff, w2t, jnp.zeros_like(w2t))

    # Second matmul: this d_ff tile's partial contribution to the output rows.
    acc_ref[...] += jnp.dot(h.astype(w2t.dtype), w2t,
                            preferred_element_type=jnp.float32)

    @pl.when(f == pl.num_programs(1) - 1)
    def _finalize():
        o_ref[...] = (acc_ref[...] + b2_ref[...]).astype(o_ref.dtype)


def feed_forward_block(x, w1, b1, w2, b2, *, tm=None, tf=None):
    """Fused Linear -> ReLU -> Dropout(eval) -> Linear.

    x : [batch, seq, dmodel]
    w1: [dmodel, d_ff] (= linear1.weight.T), b1: [d_ff]
    w2: [d_ff, dmodel] (= linear2.weight.T), b2: [dmodel]

    For best performance pass w1/w2 already in bf16 (see prepare_params): this wrapper
    performs no per-call dtype casts of the large operands.
    """
    batch, seq, dmodel = x.shape
    d_ff = w1.shape[1]
    M = batch * seq

    cfg = _chip_defaults()
    tm_target = tm if tm is not None else cfg["tm"]
    tf_target = tf if tf is not None else cfg["tf"]
    align = cfg["align"]
    vmem_limit = cfg["vmem"]

    x2 = x.reshape(M, dmodel)  # free: no data movement

    x_by = jnp.dtype(x.dtype).itemsize
    w_by = jnp.dtype(w1.dtype).itemsize
    o_by = jnp.dtype(x.dtype).itemsize

    # ---- tile selection ----------------------------------------------------
    tm_eff = min(tm_target, _round_up(M, 8))
    tf_t = min(tf_target, d_ff)

    # Fit the double-buffered working set into the per-generation VMEM budget
    # (matters most on v7x's 64 MiB). Shrink the d_ff tile first, then the row tile.
    def working_set(tm_, tf_):
        return (2 * tm_ * dmodel * x_by          # x tiles (double buffered)
                + 2 * dmodel * tf_ * w_by        # W1 tiles
                + 2 * tf_ * dmodel * w_by        # W2 tiles
                + 2 * tm_ * dmodel * o_by        # output tiles
                + tm_ * dmodel * 4               # f32 accumulator
                + 4 * (tf_ + dmodel) * 4)        # biases (negligible)

    budget = int(0.9 * (vmem_limit if vmem_limit is not None else 32 * 2 ** 20))
    while working_set(tm_eff, tf_t) > budget and tf_t > align:
        tf_t = max(align, tf_t // 2)
    while working_set(tm_eff, tf_t) > budget and tm_eff > 64:
        tm_eff = max(8, ((tm_eff // 2) // 8) * 8)

    if d_ff <= tf_t:
        tf_eff, mask_f = d_ff, False
    else:
        div = _largest_aligned_divisor(d_ff, tf_t, align)
        if div is not None:
            tf_eff, mask_f = div, False
        else:
            # No aligned divisor: keep streaming with a cdiv grid and mask the last
            # tile in-kernel (never make the full weight matrices VMEM-resident).
            tf_eff, mask_f = max(align, (tf_t // align) * align), True

    grid = (pl.cdiv(M, tm_eff), pl.cdiv(d_ff, tf_eff))

    b1_2 = b1.reshape(1, d_ff).astype(jnp.float32)
    b2_2 = b2.reshape(1, dmodel).astype(jnp.float32)

    # Weights are re-streamed from HBM once per row tile.
    n_m = grid[0]
    flops = 4 * M * dmodel * d_ff
    bytes_accessed = (x2.size * x_by
                      + n_m * (w1.size + w2.size) * w_by
                      + n_m * (d_ff + dmodel) * 4
                      + M * dmodel * o_by)

    kernel = functools.partial(ffn_kernel, d_ff=d_ff, block_f=tf_eff, mask_f=mask_f)

    # TODO(synk): on v5e, pipeline_mode=pl.Buffered(3) on the W1/W2 specs would further
    #             hide weight-DMA jitter; omitted to keep a single portable code path.
    out = pl.pallas_call(
        kernel,
        out_shape=jax.ShapeDtypeStruct((M, dmodel), x.dtype),
        grid_spec=pltpu.PrefetchScalarGridSpec(
            num_scalar_prefetch=0,
            grid=grid,
            in_specs=[
                pl.BlockSpec((tm_eff, dmodel), lambda i, f: (i, 0)),   # x rows
                pl.BlockSpec((dmodel, tf_eff), lambda i, f: (0, f)),   # W1 tile
                pl.BlockSpec((1, tf_eff),      lambda i, f: (0, f)),   # b1 slice
                pl.BlockSpec((tf_eff, dmodel), lambda i, f: (f, 0)),   # W2 tile
                pl.BlockSpec((1, dmodel),      lambda i, f: (0, 0)),   # b2
            ],
            out_specs=pl.BlockSpec((tm_eff, dmodel), lambda i, f: (i, 0)),
            scratch_shapes=[pltpu.VMEM((tm_eff, dmodel), jnp.float32)],
        ),
        compiler_params=pltpu.CompilerParams(
            dimension_semantics=("parallel", "arbitrary"),
            vmem_limit_bytes=vmem_limit,
        ),
        cost_estimate=pl.CostEstimate(
            flops=flops, transcendentals=0, bytes_accessed=bytes_accessed),
    )(x2, w1, b1_2, w2, b2_2)

    return out.reshape(batch, seq, dmodel)


def prepare_params(w1, b1, w2, b2, compute_dtype=jnp.bfloat16):
    """One-time cast of the big weight matrices to the MXU compute dtype.

    Doing this once at init (instead of per forward call) removes a full HBM
    read+write pass over both weight matrices from every call.
    """
    return (w1.astype(compute_dtype), b1.astype(jnp.float32),
            w2.astype(compute_dtype), b2.astype(jnp.float32))


def init_params(key, dmodel, d_ff, dtype=jnp.float32):
    """Deterministic init mirroring nn.Linear's uniform(-1/sqrt(fan_in), 1/sqrt(fan_in))."""
    k1, k2, k3, k4 = jax.random.split(key, 4)
    bound1 = 1.0 / math.sqrt(dmodel)
    bound2 = 1.0 / math.sqrt(d_ff)
    w1 = jax.random.uniform(k1, (dmodel, d_ff), dtype, -bound1, bound1)   # = linear1.weight.T
    b1 = jax.random.uniform(k2, (d_ff,), dtype, -bound1, bound1)
    w2 = jax.random.uniform(k3, (d_ff, dmodel), dtype, -bound2, bound2)   # = linear2.weight.T
    b2 = jax.random.uniform(k4, (dmodel,), dtype, -bound2, bound2)
    return w1, b1, w2, b2


def _reference(x, w1, b1, w2, b2):
    dmodel = x.shape[-1]
    xb = x.reshape(-1, dmodel).astype(w1.dtype)
    h = jnp.dot(xb, w1, preferred_element_type=jnp.float32) + b1.astype(jnp.float32)
    h = jnp.maximum(h, 0.0)
    o = (jnp.dot(h.astype(w2.dtype), w2, preferred_element_type=jnp.float32)
         + b2.astype(jnp.float32))
    return o.reshape(x.shape).astype(x.dtype)


if __name__ == "__main__":
    key = jax.random.PRNGKey(0)

    # Case 1: small lane-dense shape (dmodel multiple of 128), single grid step per axis.
    batch, seq, dmodel, d_ff = 2, 8, 128, 256
    kx, kp = jax.random.split(key)
    x = jax.random.normal(kx, (batch, seq, dmodel), dtype=jnp.float32)
    params = prepare_params(*init_params(kp, dmodel, d_ff))
    out = jax.block_until_ready(feed_forward_block(x, *params))
    ref = _reference(x, *params)
    assert out.shape == x.shape
    assert jnp.allclose(out, ref, atol=2e-2, rtol=2e-2), \
        float(jnp.max(jnp.abs(out - ref)))

    # Case 2: non-divisible M and d_ff -> partial row blocks + (possibly) masked last
    # d_ff tile; exercises the cdiv-grid paths with no host-side pad/slice.
    batch, seq, dmodel, d_ff = 2, 10, 128, 384
    kx, kp = jax.random.split(kp)
    x = jax.random.normal(kx, (batch, seq, dmodel), dtype=jnp.float32)
    params = prepare_params(*init_params(kp, dmodel, d_ff))
    out = jax.block_until_ready(feed_forward_block(x, *params, tm=16, tf=256))
    ref = _reference(x, *params)
    assert out.shape == x.shape
    assert jnp.allclose(out, ref, atol=2e-2, rtol=2e-2), \
        float(jnp.max(jnp.abs(out - ref)))

    print("KERNEL_OK")
</pallas_src>

<mosaic_0001>
module attributes {stable_mosaic.version = 11 : i64} {
  func.func @ffn_kernel(%arg0: i32, %arg1: i32, %arg2: memref<16x128xf32, #tpu.memory_space<vmem>>, %arg3: memref<128x256xbf16, #tpu.memory_space<vmem>>, %arg4: memref<1x256xf32, #tpu.memory_space<vmem>>, %arg5: memref<256x128xbf16, #tpu.memory_space<vmem>>, %arg6: memref<1x128xf32, #tpu.memory_space<vmem>>, %arg7: memref<16x128xf32, #tpu.memory_space<vmem>>, %arg8: memref<16x128xf32, #tpu.memory_space<vmem>>) attributes {dimension_semantics = [#tpu.dimension_semantics<parallel>, #tpu.dimension_semantics<arbitrary>], iteration_bounds = array<i64: 1, 1>, scalar_prefetch = 0 : i64, scratch_operands = 1 : i64, tpu.core_type = #tpu.core_type<tc>, window_params = [{transform_indices = @transform_0, window_bounds = array<i64: 16, 128>}, {transform_indices = @transform_1, window_bounds = array<i64: 128, 256>}, {transform_indices = @transform_2, window_bounds = array<i64: 1, 256>}, {transform_indices = @transform_3, window_bounds = array<i64: 256, 128>}, {pipeline_mode = #tpu.pipeline_mode<synchronous>, transform_indices = @transform_4, window_bounds = array<i64: 1, 128>}, {transform_indices = @transform_5, window_bounds = array<i64: 16, 128>}]} {
    %c0_i32 = arith.constant 0 : i32
    %0 = arith.cmpi eq, %arg1, %c0_i32 : i32
    %1 = arith.extui %0 : i1 to i32
    %c0_i32_0 = arith.constant 0 : i32
    %2 = arith.cmpi ne, %1, %c0_i32_0 : i32
    scf.if %2 {
      %cst_16 = arith.constant 0.000000e+00 : f32
      %21 = vector.broadcast %cst_16 : f32 to vector<16x128xf32>
      %c0_17 = arith.constant 0 : index
      %c0_18 = arith.constant 0 : index
      %22 = vector.load %arg8[%c0_17, %c0_18] : memref<16x128xf32, #tpu.memory_space<vmem>>, vector<16x128xf32>
      tpu.vector_store %arg8[%c0_17, %c0_18], %21 {strides = array<i32>} : memref<16x128xf32, #tpu.memory_space<vmem>>, vector<16x128xf32>,
    } else {
    }
    %c0 = arith.constant 0 : index
    %c0_1 = arith.constant 0 : index
    %3 = vector.load %arg2[%c0, %c0_1] : memref<16x128xf32, #tpu.memory_space<vmem>>, vector<16x128xf32>
    %4 = arith.truncf %3 : vector<16x128xf32> to vector<16x128xbf16>
    %c0_2 = arith.constant 0 : index
    %c0_3 = arith.constant 0 : index
    %5 = vector.load %arg3[%c0_2, %c0_3] : memref<128x256xbf16, #tpu.memory_space<vmem>>, vector<128x256xbf16>
    %cst = arith.constant dense<0.000000e+00> : vector<16x256xf32>
    %6 = tpu.matmul %4, %5, %cst {dimension_numbers = #tpu.dot_dimension_numbers<[1], [0], [0], [1], [0, 0, 1, 1], [], []>} : vector<16x128xbf16>, vector<128x256xbf16>, vector<16x256xf32> -> vector<16x256xf32>
    %c0_4 = arith.constant 0 : index
    %c0_5 = arith.constant 0 : index
    %7 = vector.load %arg4[%c0_4, %c0_5] : memref<1x256xf32, #tpu.memory_space<vmem>>, vector<1x256xf32>
    %8 = vector.broadcast %7 : vector<1x256xf32> to vector<16x256xf32>
    %9 = arith.addf %6, %8 : vector<16x256xf32>
    %cst_6 = arith.constant 0.000000e+00 : f32
    %10 = vector.broadcast %cst_6 : f32 to vector<16x256xf32>
    %11 = arith.maximumf %9, %10 : vector<16x256xf32>
    %c0_7 = arith.constant 0 : index
    %c0_8 = arith.constant 0 : index
    %12 = vector.load %arg5[%c0_7, %c0_8] : memref<256x128xbf16, #tpu.memory_space<vmem>>, vector<256x128xbf16>
    %c0_9 = arith.constant 0 : index
    %c0_10 = arith.constant 0 : index
    %13 = vector.load %arg8[%c0_9, %c0_10] : memref<16x128xf32, #tpu.memory_space<vmem>>, vector<16x128xf32>
    %14 = arith.truncf %11 : vector<16x256xf32> to vector<16x256xbf16>
    %cst_11 = arith.constant dense<0.000000e+00> : vector<16x128xf32>
    %15 = tpu.matmul %14, %12, %cst_11 {dimension_numbers = #tpu.dot_dimension_numbers<[1], [0], [0], [1], [0, 0, 1, 1], [], []>} : vector<16x256xbf16>, vector<256x128xbf16>, vector<16x128xf32> -> vector<16x128xf32>
    %16 = arith.addf %13, %15 : vector<16x128xf32>
    %c0_12 = arith.constant 0 : index
    %c0_13 = arith.constant 0 : index
    %17 = vector.load %arg8[%c0_12, %c0_13] : memref<16x128xf32, #tpu.memory_space<vmem>>, vector<16x128xf32>
    tpu.vector_store %arg8[%c0_12, %c0_13], %16 {strides = array<i32>} : memref<16x128xf32, #tpu.memory_space<vmem>>, vector<16x128xf32>,
    %c0_i32_14 = arith.constant 0 : i32
    %18 = arith.cmpi eq, %arg1, %c0_i32_14 : i32
    %19 = arith.extui %18 : i1 to i32
    %c0_i32_15 = arith.constant 0 : i32
    %20 = arith.cmpi ne, %19, %c0_i32_15 : i32
    scf.if %20 {
      %c0_16 = arith.constant 0 : index
      %c0_17 = arith.constant 0 : index
      %21 = vector.load %arg8[%c0_16, %c0_17] : memref<16x128xf32, #tpu.memory_space<vmem>>, vector<16x128xf32>
      %c0_18 = arith.constant 0 : index
      %c0_19 = arith.constant 0 : index
      %22 = vector.load %arg6[%c0_18, %c0_19] : memref<1x128xf32, #tpu.memory_space<vmem>>, vector<1x128xf32>
      %23 = vector.broadcast %22 : vector<1x128xf32> to vector<16x128xf32>
      %24 = arith.addf %21, %23 : vector<16x128xf32>
      %c0_20 = arith.constant 0 : index
      %c0_21 = arith.constant 0 : index
      %25 = vector.load %arg7[%c0_20, %c0_21] : memref<16x128xf32, #tpu.memory_space<vmem>>, vector<16x128xf32>
      tpu.vector_store %arg7[%c0_20, %c0_21], %24 {strides = array<i32>} : memref<16x128xf32, #tpu.memory_space<vmem>>, vector<16x128xf32>,
    } else {
    }
    return
  }
  func.func @transform_0(%arg0: i32, %arg1: i32) -> (i32, i32) {
    %c0_i32 = arith.constant 0 : i32
    %c0_i32_0 = arith.constant 0 : i32
    return %arg0, %c0_i32 : i32, i32
  }
  func.func @transform_1(%arg0: i32, %arg1: i32) -> (i32, i32) {
    %c0_i32 = arith.constant 0 : i32
    %c0_i32_0 = arith.constant 0 : i32
    return %c0_i32, %arg1 : i32, i32
  }
  func.func @transform_2(%arg0: i32, %arg1: i32) -> (i32, i32) {
    %c0_i32 = arith.constant 0 : i32
    %c0_i32_0 = arith.constant 0 : i32
    return %c0_i32, %arg1 : i32, i32
  }
  func.func @transform_3(%arg0: i32, %arg1: i32) -> (i32, i32) {
    %c0_i32 = arith.constant 0 : i32
    %c0_i32_0 = arith.constant 0 : i32
    return %arg1, %c0_i32 : i32, i32
  }
  func.func @transform_4(%arg0: i32, %arg1: i32) -> (i32, i32) {
    %c0_i32 = arith.constant 0 : i32
    %c0_i32_0 = arith.constant 0 : i32
    %c0_i32_1 = arith.constant 0 : i32
    return %c0_i32, %c0_i32_0 : i32, i32
  }
  func.func @transform_5(%arg0: i32, %arg1: i32) -> (i32, i32) {
    %c0_i32 = arith.constant 0 : i32
    %c0_i32_0 = arith.constant 0 : i32
    return %arg0, %c0_i32 : i32, i32
  }
}

</mosaic_0001>

<bundles_post_ra>
// kernel: tpu_custom_call.1
= control target key start
LH: loop header
LB: loop body
LE: loop exit
PB: predicated region body
PF: predicated region fallthrough
CT: control target
= control target key end

     0   :  { %10 = vsyncpa [#allocation4], 0  ;;  %s694_s0 = inlined_call_operand.hbm [shape: f32[16,128], index: 0, kind: input, shape index: {}]   ;;  %s695_s1 = inlined_call_operand.hbm [shape: bf16[128,256], index: 1, kind: input, shape index: {}]   ;;  %s696_s2 = inlined_call_operand.vmem [shape: f32[1,256], index: 2, kind: input, shape index: {}]   ;;  %s697_s3 = inlined_call_operand.hbm [shape: bf16[256,128], index: 3, kind: input, shape index: {}]   ;;  %s698_s4 = inlined_call_operand.vmem [shape: f32[1,128], index: 4, kind: input, shape index: {}]   ;;  %s699_s5 = inlined_call_operand.hbm [shape: f32[16,128], index: 5, kind: output, shape index: {}]  }
   0x1   :  { %11 = vsyncpa [#allocation7], 0 }
   0x2   :  { %12 = vsyncpa [#allocation5], 0  ;;  %s628_s18 = smov [#allocation6]   ;;  %s629_s20 = smov [#allocation3]  }
   0x3   :  { %s30_s19 = sshll.u32 %s628_s18, 4  ;;  %s18_s21 = sshll.u32 %s629_s20, 4  ;;  %s31_s19 = int_to_ptr.vmem [resolvable:$true] %s30_s19  ;;  %s19_s21 = int_to_ptr.vmem [resolvable:$true] %s18_s21 }
   0x4   :  { %s550_s22 = scalar_lea.vmem %s31_s19, 2048  ;;  %p555_p1 = scmp.lt.s32.totalorder %s31_s19, %s31_s19 }
   0x5   :  { %p551_p0 = scmp.ne.s32.totalorder %s31_s19, %s550_s22  ;;  %p556_p2 = scmp.lt.s32.totalorder %s550_s22, %s550_s22 }
   0x7   :  { %p557_p3 = por %p556_p2, %p555_p1 }
   0x9   :  { %p558_p4 = pnand %p557_p3, %p551_p0 }
   0xb   :  { %561 = shalt.err (!%p558_p4)
}
   0xc   :  { %s630_s23 = smov 128   ;;  %s631_s24 = smov 8  }
   0xd   :  { %36 = dma.hbm_to_vmem [thread:$0]  %s695_s1, 2048, %s31_s19, [#allocation7], %s630_s23, %s630_s23, %s631_s24  }
   0xe   :  { %s570_s27 = scalar_lea.vmem %s19_s21, 256  ;;  %p575_p6 = scmp.lt.s32.totalorder %s19_s21, %s19_s21 }
   0xf   :  { %p571_p5 = scmp.ne.s32.totalorder %s19_s21, %s570_s27  ;;  %p576_p7 = scmp.lt.s32.totalorder %s570_s27, %s570_s27 }
  0x11   :  { %p577_p8 = por %p576_p7, %p575_p6 }
  0x13   :  { %p578_p9 = pnand %p577_p8, %p571_p5 }
  0x15   :  { %581 = shalt.err (!%p578_p9)
}
  0x16   :  { %24 = dma.hbm_to_vmem [thread:$0]  %s694_s0, 256, %s19_s21, [#allocation4], %s630_s23, %s630_s23, %s631_s24  }
  0x17   :  { %s632_s30 = smov [#allocation8]  }
  0x18   :  { %s44_s6 = sshll.u32 %s632_s30, 4  ;;  %s45_s6 = int_to_ptr.vmem [resolvable:$true] %s44_s6 }
  0x19   :  { %s590_s7 = scalar_lea.vmem %s45_s6, 2048  ;;  %p595_p11 = scmp.lt.s32.totalorder %s45_s6, %s45_s6 }
  0x1a   :  { %p591_p10 = scmp.ne.s32.totalorder %s45_s6, %s590_s7  ;;  %p596_p12 = scmp.lt.s32.totalorder %s590_s7, %s590_s7 }
  0x1c   :  { %p597_p13 = por %p596_p12, %p595_p11 }
  0x1e   :  { %p598_p0 = pnand %p597_p13, %p591_p10 }
  0x20   :  { %601 = shalt.err (!%p598_p0)
}
  0x21   :  { %s633_s1 = smov 64   ;;  %s634_s8 = smov 4  }
  0x22   :  { %50 = dma.hbm_to_vmem [thread:$0]  %s697_s3, 2048, %s45_s6, [#allocation7], %s633_s1, %s633_s1, %s634_s8  }
  0x23   :  { %622 = dma.done.wait [#allocation4], 256  }
  0x24   :  { %623 = vsyncadd [#allocation4], 4294967040 }
  0x25   :  { %624 = dma.done.wait [#allocation7], 4096  }
  0x26   :  { %625 = vsyncadd [#allocation7], 4294963200  ;;  %v635_v0 = vmov 0   ;;  %v502_v1 = vld [vmem:[#allocation6 + $0x74] ss:$8 sps:$4 sm:$0xff]   ;;  %v530_v16 = vld [vmem:[#allocation8 + $0x68] sm:$0xff]   ;;  %v90_v36 = vlaneseq }
  0x27   :  { %212 = vmatprep.mubr.bf16.mxu0 %v635_v0  ;;  %v504_v2 = vld [vmem:[#allocation6 + $0x70] ss:$8 sps:$4 sm:$0xff]   ;;  %180 = vmatprep.subr.bf16.mxu0 %v502_v1  ;;  %v505_v3 = vld [vmem:[#allocation6 + $0x64] ss:$8 sps:$4 sm:$0xff]   ;;  %v507_v4 = vld [vmem:[#allocation6 + $0x60] ss:$8 sps:$4 sm:$0xff]  }
  0x28   :  { %181 = vmatpush1.bf16.msra.mxu0 %v504_v2  ;;  %v508_v5 = vld [vmem:[#allocation6 + $0x54] ss:$8 sps:$4 sm:$0xff]   ;;  %v510_v6 = vld [vmem:[#allocation6 + $0x50] ss:$8 sps:$4 sm:$0xff]   ;;  %v511_v7 = vld [vmem:[#allocation6 + $0x44] ss:$8 sps:$4 sm:$0xff]  }
  0x29   :  { %182 = vmatprep.subr.bf16.mxu0 %v505_v3  ;;  %v513_v8 = vld [vmem:[#allocation6 + $0x40] ss:$8 sps:$4 sm:$0xff]   ;;  %v514_v9 = vld [vmem:[#allocation6 + $0x34] ss:$8 sps:$4 sm:$0xff]   ;;  %v516_v11 = vld [vmem:[#allocation6 + $0x30] ss:$8 sps:$4 sm:$0xff]  }
  0x2a   :  { %v526_v10 = vld [vmem:[#allocation8 + $0x78] sm:$0xff]   ;;  %v517_v13 = vld [vmem:[#allocation6 + $0x24] ss:$8 sps:$4 sm:$0xff]   ;;  %v528_v14 = vld [vmem:[#allocation8 + $0x70] sm:$0xff]   ;;  %v91_v37 = vshrl.u32 %v90_v36, 7  ;;  %s636_s12 = smov [#allocation9]  }
  0x2b   :  { %v527_v12 = vld [vmem:[#allocation8 + $0x38] sm:$0xff]   ;;  %471 = vmatprep.subr.bf16.mxu1 %v526_v10  ;;  %v529_v15 = vld [vmem:[#allocation8 + $0x30] sm:$0xff]   ;;  %v519_v17 = vld [vmem:[#allocation6 + $0x20] ss:$8 sps:$4 sm:$0xff]   ;;  %s425_s13 = sshll.u32 %s636_s12, 4  ;;  %s426_s13 = int_to_ptr.vmem [resolvable:$true] %s425_s13 }
  0x2c   :  { %183 = vmatpush1.bf16.msra.mxu0 %v507_v4  ;;  %472 = vmatpush3.bf16.msra.mxu1 %v527_v12  ;;  %v520_v18 = vld [vmem:[#allocation6 + $0x14] ss:$8 sps:$4 sm:$0xff]   ;;  %v531_v19 = vld [vmem:[#allocation8 + $0x28] sm:$0xff]   ;;  %v532_v20 = vld [vmem:[#allocation8 + $0x60] sm:$0xff]   ;;  %v96_v38 = vsub.s32 1, %v91_v37  ;;  %v92_v39 = vsub.s32 0, %v91_v37  ;;  %p607_p2 = scmp.lt.s32.totalorder %s426_s13, %s426_s13 }
  0x2d   :  { %184 = vmatprep.subr.bf16.mxu0 %v508_v5  ;;  %473 = vmatprep.subr.bf16.mxu1 %v528_v14  ;;  %v522_v21 = vld [vmem:[#allocation6 + $0x10] ss:$8 sps:$4 sm:$0xff]   ;;  %v533_v22 = vld [vmem:[#allocation8 + $0x20] sm:$0xff]   ;;  %v538_v32 = vld [vmem:[#allocation8 + $0x48] sm:$0xff]   ;;  %s602_s14 = scalar_lea.vmem %s426_s13, 256 }
  0x2e   :  { %v523_v23 = vld [vmem:[#allocation6 + $0x4] ss:$8 sps:$4 sm:$0xff]   ;;  %v534_v24 = vld [vmem:[#allocation8 + $0x58] sm:$0xff]   ;;  %v525_v25 = vld [vmem:[#allocation6] ss:$8 sps:$4 sm:$0xff]   ;;  %p603_p1 = scmp.ne.s32.totalorder %s426_s13, %s602_s14  ;;  %p608_p3 = scmp.lt.s32.totalorder %s602_s14, %s602_s14 }
  0x2f   :  { %v69_v26 = vld [vmem:[#allocation3] sm:$0xff]  ;;  %v70_v27 = vld [vmem:[#allocation3 + $0x8] sm:$0xff]  ;;  %v539_v33 = vld [vmem:[#allocation8 + $0x8] sm:$0xff]  }
  0x30   :  { %185 = vmatpush1.bf16.msra.mxu0 %v510_v6  ;;  %474 = vmatpush3.bf16.msra.mxu1 %v529_v15  ;;  %v535_v28 = vld [vmem:[#allocation8 + $0x18] sm:$0xff]   ;;  %v71_v29 = vpack.c.bf16 %v70_v27, %v69_v26  ;;  %v536_v30 = vld [vmem:[#allocation8 + $0x50] sm:$0xff]   ;;  %v540_v34 = vld [vmem:[#allocation8 + $0x40] sm:$0xff]   ;;  %p609_p4 = por %p608_p3, %p607_p2 }
  0x31   :  { %186 = vmatprep.subr.bf16.mxu0 %v511_v7  ;;  %475 = vmatprep.subr.bf16.mxu1 %v530_v16  ;;  %v537_v31 = vld [vmem:[#allocation8 + $0x10] sm:$0xff]   ;;  %v541_v35 = vld [vmem:[#allocation8] sm:$0xff]  }
  0x32   :  { %v88_v40 = vld [vmem:[%s696_s2] sm:$0x3]  ;;  %p610_p5 = pnand %p609_p4, %p603_p1 }
  0x33   :  { %v97_v42 = vrot.slane %v88_v40, %v96_v38  ;;  %v93_v43 = vrot.slane %v88_v40, %v92_v39  ;;  %v470_v59 = vld [vmem:[%s698_s4] ss:$0 sm:$0xff] }
  0x34   :  { %187 = vmatpush1.bf16.msra.mxu0 %v513_v8  ;;  %476 = vmatpush3.bf16.msra.mxu1 %v531_v19 }
  0x35   :  { %188 = vmatprep.subr.bf16.mxu0 %v514_v9  ;;  %477 = vmatprep.subr.bf16.mxu1 %v532_v20 }
  0x38   :  { %189 = vmatpush1.bf16.msra.mxu0 %v516_v11  ;;  %478 = vmatpush3.bf16.msra.mxu1 %v533_v22 }
  0x39   :  { %190 = vmatprep.subr.bf16.mxu0 %v517_v13  ;;  %479 = vmatprep.subr.bf16.mxu1 %v534_v24 }
  0x3c   :  { %191 = vmatpush1.bf16.msra.mxu0 %v519_v17  ;;  %480 = vmatpush3.bf16.msra.mxu1 %v535_v28 }
  0x3d   :  { %192 = vmatprep.subr.bf16.mxu0 %v520_v18  ;;  %481 = vmatprep.subr.bf16.mxu1 %v536_v30 }
  0x40   :  { %193 = vmatpush1.bf16.msra.mxu0 %v522_v21  ;;  %482 = vmatpush3.bf16.msra.mxu1 %v537_v31 }
  0x41   :  { %194 = vmatprep.subr.bf16.mxu0 %v523_v23  ;;  %483 = vmatprep.subr.bf16.mxu1 %v538_v32 }
  0x44   :  { %195 = vmatpush1.bf16.msra.mxu0 %v525_v25  ;;  %484 = vmatpush3.bf16.msra.mxu1 %v539_v33 }
  0x45   :  { %485 = vmatprep.subr.bf16.mxu1 %v540_v34 }
  0x47   :  { %213 = vmatmul.mubr.bf16.vlgmr.msra.gmra.mxu0 %v71_v29 }
  0x48   :  { %486 = vmatpush3.bf16.msra.mxu1 %v541_v35 }
 0x107   :  { %v214_v41 = vpop.f32.mrf.mxu0 }
 0x108   :  { %v215_v48 = vadd.f32 %v214_v41, %v93_v43 }
 0x109   :  { %v216_v44 = vpop.f32.mrf.mxu0 }
 0x10a   :  { %v217_v46 = vadd.f32 %v216_v44, %v97_v42  ;;  %v223_v54 = vmax.f32 %v215_v48, 0.0 }
 0x10b   :  { %v218_v45 = vpop.f32.mrf.mxu0 }
 0x10c   :  { %v219_v47 = vadd.f32 %v218_v45, %v93_v43  ;;  %v224_v52 = vmax.f32 %v217_v46, 0.0 }
 0x10d   :  { %v220_v49 = vpop.f32.mrf.mxu0 }
 0x10e   :  { %v221_v50 = vadd.f32 %v220_v49, %v97_v42  ;;  %v225_v51 = vmax.f32 %v219_v47, 0.0 }
 0x110   :  { %v226_v53 = vmax.f32 %v221_v50, 0.0  ;;  %v261_v56 = vpack.c.bf16 %v225_v51, %v223_v54 }
 0x112   :  { %v262_v55 = vpack.c.bf16 %v226_v53, %v224_v52 }
 0x114   :  { %391 = vmatprep.mubr.bf16.mxu1 %v262_v55 }
 0x115   :  { %392 = vmatmul.mubr.bf16.vlgmr.msra.gmra.mxu1 %v261_v56 }
 0x1d5   :  { %v487_v57 = vpop.f32.mrf.mxu1 }
 0x1d7   :  { %v488_v58 = vpop.f32.mrf.mxu1 }
 0x1d8   :  { %v489_v60 = vadd.f32 %v488_v58, %v487_v57 }
 0x1d9   :  { %v490_v61 = vpop.f32.mrf.mxu1 }
 0x1da   :  { %v416_v62 = vadd.f32 %v489_v60, %v470_v59 }
 0x1db   :  { %v491_v63 = vpop.f32.mrf.mxu1 }
 0x1dc   :  { %418 = vst [vmem:[#allocation9] sm:$0xff] %v416_v62  ;;  %v492_v0 = vadd.f32 %v491_v63, %v490_v61 }
 0x1de   :  { %v417_v1 = vadd.f32 %v492_v0, %v470_v59 }
 0x1e0   :  { %419 = vst [vmem:[#allocation9 + $0x8] sm:$0xff] %v417_v1 }
 0x1e1   :  { %613 = shalt.err (!%p610_p5)
}
 0x1e2   :  { %431 = dma.vmem_to_hbm [thread:$0]  %s426_s13, 256, %s699_s5, [#allocation5], %s630_s23, %s630_s23, %s631_s24  }
 0x1e3   :  { %626 = dma.done.wait [#allocation5], 256  }
 0x1e4   :  { %627 = vsyncadd [#allocation5], 4294967040 }
 0x1e5   :  { %435 = vsyncpa [#allocation4], 1 }
 0x1e6   :  { %436 = vsyncpa [#allocation7], 1 }
 0x1e7   :  { %437 = vsyncpa [#allocation5], 1 }

</bundles_post_ra>
